<compile_context>
chip_gen: v7x
topology: tpu7x:2x2x1
jax: 0.10.0
libtpu: 0.0.40
codegen_flags: <defaults>
</compile_context>

<pallas_src>
import functools

import jax
import jax.numpy as jnp
from jax.experimental import pallas as pl
from jax.experimental.pallas import tpu as pltpu


def _make_mlp_kernel(num_layers, activation, compute_dtype):
    """Fused kernel: refs = (x_tile, w0, b0, w1, b1, ..., out).

    x_tile : (TM, K0)   caller dtype, batch-major tile (as stored in HBM)
    w_i    : (out_i, in_i)  compute dtype (PyTorch layout), VMEM resident
    b_i    : (out_i, 1)     f32, VMEM resident
    out    : (out_last, TM) f32, lane-dense final sigmoid output
    """
    f32_compute = jnp.dtype(compute_dtype) == jnp.dtype(jnp.float32)
    # For the exact-f32 path use HIGHEST MXU precision so results match an
    # f32 reference; bf16 inputs are exact on the MXU so default is fine.
    mxu_precision = jax.lax.Precision.HIGHEST if f32_compute else None
    # v6e/v7x have a bf16 EUP: apply tanh/logistic hidden activations in the
    # compute dtype (roughly doubles transcendental throughput there); relu is
    # dtype-agnostic and the final sigmoid always stays in f32.
    transcendental_in_compute = (
        jnp.dtype(compute_dtype) == jnp.dtype(jnp.bfloat16)
        and activation in ("tanh", "logistic", "sigmoid"))

    def kernel(*refs):
        x_ref = refs[0]
        o_ref = refs[-1]
        wb = refs[1:-1]

        # Cast the activation tile to the MXU dtype *inside* the kernel: no
        # extra host-side HBM pass over x.
        h = x_ref[...].astype(compute_dtype)                 # (TM, K0)

        y = None
        for li in range(num_layers):
            w = wb[2 * li][...]                              # (out, in)
            b = wb[2 * li + 1][...]                          # (out, 1) f32
            if li == 0:
                # y = W @ x^T without a host-side transpose of x: contract the
                # feature axis of W (dim 1) with the tile's feature axis.
                y = jax.lax.dot_general(
                    w, h, (((1,), (1,)), ((), ())),
                    precision=mxu_precision,
                    preferred_element_type=jnp.float32)      # (out0, TM)
            else:
                y = jnp.dot(w, h, precision=mxu_precision,
                            preferred_element_type=jnp.float32)
            y = y + b                                        # f32 epilogue
            if li == num_layers - 1:
                y = jax.nn.sigmoid(y)                        # final Sigmoid, f32
            else:
                if activation == "relu":
                    h = jnp.maximum(y, 0.0).astype(compute_dtype)
                elif activation == "tanh":
                    h = (jnp.tanh(y.astype(compute_dtype))
                         if transcendental_in_compute
                         else jnp.tanh(y).astype(compute_dtype))
                elif activation in ("logistic", "sigmoid"):
                    h = (jax.nn.sigmoid(y.astype(compute_dtype))
                         if transcendental_in_compute
                         else jax.nn.sigmoid(y).astype(compute_dtype))
                else:
                    # PyTorch spec: an unknown activation string appends NO
                    # activation layer -> identity (deliberate, not a fallback).
                    h = y.astype(compute_dtype)
        o_ref[...] = y.astype(o_ref.dtype)                   # lane-dense store

    return kernel


def init_mlp_params(key, input_size, hidden_layers):
    """torch.nn.Linear default init: U(-1/sqrt(fan_in), 1/sqrt(fan_in)).

    Weights kept in PyTorch layout (out_features, in_features), f32.
    """
    params = []
    prev = input_size
    for size in list(hidden_layers) + [1]:
        key, kw, kb = jax.random.split(key, 3)
        bound = 1.0 / float(prev) ** 0.5
        w = jax.random.uniform(kw, (size, prev), jnp.float32, -bound, bound)
        b = jax.random.uniform(kb, (size,), jnp.float32, -bound, bound)
        params.append((w, b))
        prev = size
    return params


def prepare_mlp_params(params, compute_dtype=jnp.bfloat16):
    """One-time parameter prep (hoisted out of the per-call path).

    Casts weights to the MXU compute dtype and reshapes biases to f32 (out, 1)
    columns, so repeated forward calls never re-stream the weights through HBM
    just to cast them.  bf16 is the default on all generations (v5e/v6e/v7x
    MXUs take bf16 natively with f32 accumulation); pass
    compute_dtype=jnp.float32 for exact-f32 inference.
    """
    prepped = []
    for w, b in params:
        out_f = w.shape[0]
        prepped.append((jnp.asarray(w, dtype=compute_dtype),
                        jnp.asarray(b, dtype=jnp.float32).reshape(out_f, 1)))
    return tuple(prepped)


@functools.partial(jax.jit, static_argnames=("activation", "tm"))
def mlp_forward(x, params, activation="relu", *, tm=1024):
    """Forward pass of MLPModel as one fused Pallas kernel.

    x      : (batch, input_size), caller layout/dtype (no host pad/transpose).
    params : output of prepare_mlp_params.
    Returns (batch, 1) f32 probabilities.
    """
    batch, in_features = x.shape
    num_layers = len(params)
    compute_dtype = params[0][0].dtype
    widest = max(w.shape[0] for w, _ in params)
    out_features = params[-1][0].shape[0]          # == 1 for this module

    # ---- batch tile size --------------------------------------------------
    if batch <= 128:
        TM = batch                                  # one exact block
    else:
        tm_cap = tm
        if widest >= 512:
            tm_cap = min(tm_cap, 256)               # vreg-spill guard
        m128 = pl.cdiv(batch, 128) * 128
        if m128 >= 256:
            # >=2 tiles so both v7x TensorCores get work under "parallel".
            tm_cap = min(tm_cap, max(128, pl.cdiv(m128 // 2, 128) * 128))
        TM = max(128, min(tm_cap, (batch // 128) * 128))
    grid = pl.cdiv(batch, TM)
    m_pad = grid * TM                               # Pallas-allocated out width

    # ---- explicit VMEM budget (v7x: 64 MiB physical, 32 MiB default scoped) -
    cdsize = jnp.dtype(compute_dtype).itemsize
    weight_bytes = sum(w.size * cdsize + b.size * 4 for w, b in params)
    x_block_bytes = TM * in_features * jnp.dtype(x.dtype).itemsize
    act_bytes = 2 * widest * TM * 4                 # live f32 intermediates
    out_block_bytes = out_features * TM * 4
    est = weight_bytes + 2 * (x_block_bytes + out_block_bytes) + act_bytes
    try:
        vmem_cap = pltpu.get_tpu_info().vmem_capacity_bytes
    except Exception:
        vmem_cap = 64 * 1024 * 1024
    vmem_limit = int(min(vmem_cap, max(32 * 1024 * 1024, 2 * est)))
    # TODO(synk): if weight_bytes alone approaches vmem_limit (very wide/deep
    # MLPs), switch the big layers to a K/N-tiled inner pipeline instead of
    # whole-array residency.

    # ---- specs --------------------------------------------------------------
    inputs = [x]
    in_specs = [pl.BlockSpec((TM, in_features), lambda i: (i, 0))]
    invariant = pl.Buffered(1)                      # grid-invariant -> 1 buffer
    for (w, b) in params:
        out_f, in_f = w.shape
        inputs.append(w)
        in_specs.append(pl.BlockSpec((out_f, in_f), lambda i: (0, 0),
                                     pipeline_mode=invariant))
        inputs.append(b)
        in_specs.append(pl.BlockSpec((out_f, 1), lambda i: (0, 0),
                                     pipeline_mode=invariant))

    # Advisory cost hint so XLA schedules around the custom call.
    flops = 2 * batch * sum(w.shape[0] * w.shape[1] for w, _ in params)
    hidden_elems = batch * sum(w.shape[0] for w, _ in params[:-1])
    transcendentals = batch * out_features + (
        hidden_elems if activation in ("tanh", "logistic", "sigmoid") else 0)
    bytes_accessed = (x.size * jnp.dtype(x.dtype).itemsize
                      + weight_bytes + out_features * m_pad * 4)
    cost = pl.CostEstimate(flops=flops, transcendentals=transcendentals,
                           bytes_accessed=bytes_accessed)

    yT = pl.pallas_call(
        _make_mlp_kernel(num_layers, activation, compute_dtype),
        out_shape=jax.ShapeDtypeStruct((out_features, m_pad), jnp.float32),
        grid=(grid,),
        in_specs=in_specs,
        out_specs=pl.BlockSpec((out_features, TM), lambda i: (0, i)),
        compiler_params=pltpu.CompilerParams(
            dimension_semantics=("parallel",),   # shard batch tiles over TCs
            vmem_limit_bytes=vmem_limit,
        ),
        cost_estimate=cost,
    )(*inputs)

    # Drop the (garbage) padded columns of the ragged last tile and return in
    # PyTorch layout (batch, 1).
    return yT[:, :batch].T


if __name__ == "__main__":
    # Small shapes consistent with the module's forward.
    batch = 8
    input_size = 32
    hidden_layers = [64, 32]

    key = jax.random.PRNGKey(0)
    kx, kp = jax.random.split(key)
    x = jax.random.normal(kx, (batch, input_size), jnp.float32)
    params = init_mlp_params(kp, input_size, hidden_layers)

    # Plain-JAX reference (same math, PyTorch weight layout, accurate f32).
    h_ref = x
    for i, (w, b) in enumerate(params):
        h_ref = jnp.dot(h_ref, w.T, precision=jax.lax.Precision.HIGHEST) + b
        if i < len(params) - 1:
            h_ref = jnp.maximum(h_ref, 0.0)
        else:
            h_ref = jax.nn.sigmoid(h_ref)

    # Exact-f32 path: strict correctness check.
    prep_f32 = prepare_mlp_params(params, compute_dtype=jnp.float32)
    out_f32 = jax.block_until_ready(mlp_forward(x, prep_f32, activation="relu"))
    assert out_f32.shape == (batch, 1)
    assert jnp.allclose(out_f32, h_ref, atol=1e-5, rtol=1e-5)

    # Default bf16 MXU path (all generations): looser tolerance.
    prep_bf16 = prepare_mlp_params(params)          # bf16 weights by default
    out_bf16 = jax.block_until_ready(mlp_forward(x, prep_bf16, activation="relu"))
    assert out_bf16.shape == (batch, 1)
    assert jnp.allclose(out_bf16, h_ref, atol=3e-2)

    print("KERNEL_OK")
</pallas_src>

<mosaic_0001>
module attributes {stable_mosaic.version = 11 : i64} {
  func.func @kernel(%arg0: i32, %arg1: memref<8x32xf32, #tpu.memory_space<vmem>>, %arg2: memref<64x32xf32, #tpu.memory_space<vmem>>, %arg3: memref<64x1xf32, #tpu.memory_space<vmem>>, %arg4: memref<32x64xf32, #tpu.memory_space<vmem>>, %arg5: memref<32x1xf32, #tpu.memory_space<vmem>>, %arg6: memref<1x32xf32, #tpu.memory_space<vmem>>, %arg7: memref<1x1xf32, #tpu.memory_space<vmem>>, %arg8: memref<1x8xf32, #tpu.memory_space<vmem>>) attributes {dimension_semantics = [#tpu.dimension_semantics<parallel>], iteration_bounds = array<i64: 1>, scalar_prefetch = 0 : i64, scratch_operands = 0 : i64, tpu.core_type = #tpu.core_type<tc>, window_params = [{transform_indices = @transform_0, window_bounds = array<i64: 8, 32>}, {pipeline_mode = #tpu.pipeline_mode<synchronous>, transform_indices = @transform_1, window_bounds = array<i64: 64, 32>}, {pipeline_mode = #tpu.pipeline_mode<synchronous>, transform_indices = @transform_2, window_bounds = array<i64: 64, 1>}, {pipeline_mode = #tpu.pipeline_mode<synchronous>, transform_indices = @transform_3, window_bounds = array<i64: 32, 64>}, {pipeline_mode = #tpu.pipeline_mode<synchronous>, transform_indices = @transform_4, window_bounds = array<i64: 32, 1>}, {pipeline_mode = #tpu.pipeline_mode<synchronous>, transform_indices = @transform_5, window_bounds = array<i64: 1, 32>}, {pipeline_mode = #tpu.pipeline_mode<synchronous>, transform_indices = @transform_6, window_bounds = array<i64: 1, 1>}, {transform_indices = @transform_7, window_bounds = array<i64: 1, 8>}]} {
    %c0 = arith.constant 0 : index
    %c0_0 = arith.constant 0 : index
    %0 = vector.load %arg1[%c0, %c0_0] : memref<8x32xf32, #tpu.memory_space<vmem>>, vector<8x32xf32>
    %c0_1 = arith.constant 0 : index
    %c0_2 = arith.constant 0 : index
    %1 = vector.load %arg2[%c0_1, %c0_2] : memref<64x32xf32, #tpu.memory_space<vmem>>, vector<64x32xf32>
    %c0_3 = arith.constant 0 : index
    %c0_4 = arith.constant 0 : index
    %2 = vector.load %arg3[%c0_3, %c0_4] : memref<64x1xf32, #tpu.memory_space<vmem>>, vector<64x1xf32>
    %cst = arith.constant dense<0.000000e+00> : vector<64x8xf32>
    %3 = tpu.matmul %1, %0, %cst {dimension_numbers = #tpu.dot_dimension_numbers<[1], [1], [0], [0], [0, 0, 1, 0], [], []>, precision = #tpu.contract_precision<fp32>} : vector<64x32xf32>, vector<8x32xf32>, vector<64x8xf32> -> vector<64x8xf32>
    %4 = vector.broadcast %2 : vector<64x1xf32> to vector<64x8xf32>
    %5 = arith.addf %3, %4 : vector<64x8xf32>
    %cst_5 = arith.constant 0.000000e+00 : f32
    %6 = vector.broadcast %cst_5 : f32 to vector<64x8xf32>
    %7 = arith.maximumf %5, %6 : vector<64x8xf32>
    %c0_6 = arith.constant 0 : index
    %c0_7 = arith.constant 0 : index
    %8 = vector.load %arg4[%c0_6, %c0_7] : memref<32x64xf32, #tpu.memory_space<vmem>>, vector<32x64xf32>
    %c0_8 = arith.constant 0 : index
    %c0_9 = arith.constant 0 : index
    %9 = vector.load %arg5[%c0_8, %c0_9] : memref<32x1xf32, #tpu.memory_space<vmem>>, vector<32x1xf32>
    %cst_10 = arith.constant dense<0.000000e+00> : vector<32x8xf32>
    %10 = tpu.matmul %8, %7, %cst_10 {dimension_numbers = #tpu.dot_dimension_numbers<[1], [0], [0], [1], [0, 0, 1, 1], [], []>, precision = #tpu.contract_precision<fp32>} : vector<32x64xf32>, vector<64x8xf32>, vector<32x8xf32> -> vector<32x8xf32>
    %11 = vector.broadcast %9 : vector<32x1xf32> to vector<32x8xf32>
    %12 = arith.addf %10, %11 : vector<32x8xf32>
    %cst_11 = arith.constant 0.000000e+00 : f32
    %13 = vector.broadcast %cst_11 : f32 to vector<32x8xf32>
    %14 = arith.maximumf %12, %13 : vector<32x8xf32>
    %c0_12 = arith.constant 0 : index
    %c0_13 = arith.constant 0 : index
    %15 = vector.load %arg6[%c0_12, %c0_13] : memref<1x32xf32, #tpu.memory_space<vmem>>, vector<1x32xf32>
    %c0_14 = arith.constant 0 : index
    %c0_15 = arith.constant 0 : index
    %16 = vector.load %arg7[%c0_14, %c0_15] : memref<1x1xf32, #tpu.memory_space<vmem>>, vector<1x1xf32>
    %cst_16 = arith.constant dense<0.000000e+00> : vector<1x8xf32>
    %17 = tpu.matmul %15, %14, %cst_16 {dimension_numbers = #tpu.dot_dimension_numbers<[1], [0], [0], [1], [0, 0, 1, 1], [], []>, precision = #tpu.contract_precision<fp32>} : vector<1x32xf32>, vector<32x8xf32>, vector<1x8xf32> -> vector<1x8xf32>
    %18 = vector.broadcast %16 : vector<1x1xf32> to vector<1x8xf32>
    %19 = arith.addf %17, %18 : vector<1x8xf32>
    %20 = arith.negf %19 : vector<1x8xf32>
    %21 = math.exp %20 : vector<1x8xf32>
    %cst_17 = arith.constant 1.000000e+00 : f32
    %22 = vector.broadcast %cst_17 : f32 to vector<1x8xf32>
    %23 = arith.addf %22, %21 : vector<1x8xf32>
    %24 = arith.divf %22, %23 : vector<1x8xf32>
    %c0_18 = arith.constant 0 : index
    %c0_19 = arith.constant 0 : index
    %25 = vector.load %arg8[%c0_18, %c0_19] : memref<1x8xf32, #tpu.memory_space<vmem>>, vector<1x8xf32>
    tpu.vector_store %arg8[%c0_18, %c0_19], %24 {strides = array<i32>} : memref<1x8xf32, #tpu.memory_space<vmem>>, vector<1x8xf32>,
    return
  }
  func.func @transform_0(%arg0: i32) -> (i32, i32) {
    %c0_i32 = arith.constant 0 : i32
    %c0_i32_0 = arith.constant 0 : i32
    return %arg0, %c0_i32 : i32, i32
  }
  func.func @transform_1(%arg0: i32) -> (i32, i32) {
    %c0_i32 = arith.constant 0 : i32
    %c0_i32_0 = arith.constant 0 : i32
    %c0_i32_1 = arith.constant 0 : i32
    return %c0_i32, %c0_i32_0 : i32, i32
  }
  func.func @transform_2(%arg0: i32) -> (i32, i32) {
    %c0_i32 = arith.constant 0 : i32
    %c0_i32_0 = arith.constant 0 : i32
    %c0_i32_1 = arith.constant 0 : i32
    return %c0_i32, %c0_i32_0 : i32, i32
  }
  func.func @transform_3(%arg0: i32) -> (i32, i32) {
    %c0_i32 = arith.constant 0 : i32
    %c0_i32_0 = arith.constant 0 : i32
    %c0_i32_1 = arith.constant 0 : i32
    return %c0_i32, %c0_i32_0 : i32, i32
  }
  func.func @transform_4(%arg0: i32) -> (i32, i32) {
    %c0_i32 = arith.constant 0 : i32
    %c0_i32_0 = arith.constant 0 : i32
    %c0_i32_1 = arith.constant 0 : i32
    return %c0_i32, %c0_i32_0 : i32, i32
  }
  func.func @transform_5(%arg0: i32) -> (i32, i32) {
    %c0_i32 = arith.constant 0 : i32
    %c0_i32_0 = arith.constant 0 : i32
    %c0_i32_1 = arith.constant 0 : i32
    return %c0_i32, %c0_i32_0 : i32, i32
  }
  func.func @transform_6(%arg0: i32) -> (i32, i32) {
    %c0_i32 = arith.constant 0 : i32
    %c0_i32_0 = arith.constant 0 : i32
    %c0_i32_1 = arith.constant 0 : i32
    return %c0_i32, %c0_i32_0 : i32, i32
  }
  func.func @transform_7(%arg0: i32) -> (i32, i32) {
    %c0_i32 = arith.constant 0 : i32
    %c0_i32_0 = arith.constant 0 : i32
    return %c0_i32, %arg0 : i32, i32
  }
}

</mosaic_0001>

<bundles_post_ra>
// kernel: mlp_forward.1
= control target key start
LH: loop header
LB: loop body
LE: loop exit
PB: predicated region body
PF: predicated region fallthrough
CT: control target
= control target key end

     0   :  { %s3217_s0 = inlined_call_operand.vmem [shape: f32[8,32], index: 0, kind: input, shape index: {}]   ;;  %s3218_s1 = inlined_call_operand.vmem [shape: f32[64,32], index: 1, kind: input, shape index: {}]   ;;  %s3219_s2 = inlined_call_operand.vmem [shape: f32[64,1], index: 2, kind: input, shape index: {}]   ;;  %s3220_s3 = inlined_call_operand.vmem [shape: f32[32,64], index: 3, kind: input, shape index: {}]   ;;  %s3221_s4 = inlined_call_operand.vmem [shape: f32[32,1], index: 4, kind: input, shape index: {}]   ;;  %s3222_s5 = inlined_call_operand.vmem [shape: f32[1,32], index: 5, kind: input, shape index: {}]   ;;  %s3223_s6 = inlined_call_operand.<no memory space> [shape: f32[1,1], index: 6, kind: input, shape index: {}]   ;;  %s3224_s7 = inlined_call_operand.hbm [shape: f32[1,8], index: 7, kind: output, shape index: {}]  }
   0x1   :  { %v12_v0 = vstv %s3223_s6 }
   0x2   :  { %13 = vst [vmem:[#allocation2] sm:$0x1] %v12_v0 }
   0x3   :  { %v29_v1 = vld [vmem:[%s3217_s0] sm:$0xff]  ;;  %vm86_vm0 = vcmask 261120   ;;  %v31_v3 = vld [vmem:[%s3218_s1 + $0x8] sm:$0xff]  ;;  %v32_v6 = vld [vmem:[%s3218_s1 + $0x10] sm:$0xff]  ;;  %v2789_v9 = vmov 0  }
   0x4   :  { %v30_v2 = vld [vmem:[%s3218_s1] sm:$0xff]  ;;  %v112_v4 = vsel %vm86_vm0, %v29_v1, 0  ;;  %v33_v7 = vld [vmem:[%s3218_s1 + $0x18] sm:$0xff]  ;;  %2759 = vset.pattern.permute.xlu0 %v2789_v9  ;;  %2760 = vset.pattern.permute.xlu1 %v2789_v9  ;;  %v91_v12 = vsel %vm86_vm0, %v31_v3, 0  ;;  %v94_v13 = vsel %vm86_vm0, %v32_v6, 0  ;;  %v35_v14 = vld [vmem:[%s3218_s1 + $0x28] sm:$0xff] }
   0x5   :  { %v88_v5 = vsel %vm86_vm0, %v30_v2, 0  ;;  %v34_v8 = vld [vmem:[%s3218_s1 + $0x20] sm:$0xff]  ;;  %v2857_v10 = vand.u32 4294901760, %v112_v4  ;;  %v97_v15 = vsel %vm86_vm0, %v33_v7, 0  ;;  %v36_v19 = vld [vmem:[%s3218_s1 + $0x30] sm:$0xff]  ;;  %v2882_v21 = vand.u32 4294901760, %v91_v12 }
   0x6   :  { %v2859_v11 = vand.u32 4294901760, %v88_v5  ;;  %v100_v16 = vsel %vm86_vm0, %v34_v8, 0  ;;  %v38_v17 = vld [vmem:[%s3219_s2] sm:$0xff]  ;;  %v40_v20 = vld [vmem:[%s3219_s2 + $0x10] sm:$0xff]  ;;  %v2884_v22 = vand.u32 4294901760, %v94_v13  ;;  %v2886_v23 = vand.u32 4294901760, %v97_v15 }
   0x7   :  { %v2872_v18 = vsub.f32 %v112_v4, %v2857_v10  ;;  %2258 = vmatprep.subr.mxu1 %v2857_v10  ;;  %v103_v24 = vsel %vm86_vm0, %v35_v14, 0  ;;  %48 = vperm.xlu0 %2759, %v38_v17   ;;  %v2893_v26 = vand.u32 4294901760, %v100_v16  ;;  %v37_v27 = vld [vmem:[%s3218_s1 + $0x38] sm:$0xff]  ;;  %v39_v29 = vld [vmem:[%s3219_s2 + $0x8] sm:$0xff]  ;;  %v2905_v30 = vsub.f32 %v91_v12, %v2882_v21 }
   0x8   :  { %2274 = vmatprep.mubr.f32.mxu0 %v2859_v11  ;;  %2259 = vmatpush3.xpose.msra.mxu1 %v2857_v10  ;;  %v2899_v28 = vsub.f32 %v88_v5, %v2859_v11  ;;  %v106_v31 = vsel %vm86_vm0, %v36_v19, 0  ;;  %v2909_v32 = vsub.f32 %v94_v13, %v2884_v22  ;;  %v2912_v33 = vsub.f32 %v97_v15, %v2886_v23  ;;  %v41_v34 = vld [vmem:[%s3219_s2 + $0x18] sm:$0xff] }
   0x9   :  { %v2891_v25 = vand.u32 4294901760, %v2872_v18  ;;  %58 = vperm.xlu1 %2760, %v40_v20   ;;  %v2919_v36 = vand.u32 4294901760, %v103_v24  ;;  %v2922_v37 = vsub.f32 %v100_v16, %v2893_v26 }
   0xa   :  { %v182_v38 = vand.u32 4294901760, %v2899_v28 }
   0xb   :  { %v264_v35 = vsub.f32 %v2872_v18, %v2891_v25 }
   0xc   :  { %14 = vsyncpa [#allocation4], 0  ;;  %v109_v39 = vsel %vm86_vm0, %v37_v27, 0  ;;  %v192_v40 = vand.u32 4294901760, %v2905_v30  ;;  %v202_v41 = vand.u32 4294901760, %v2909_v32  ;;  %v212_v42 = vand.u32 4294901760, %v2912_v33  ;;  %53 = vperm.xlu0 %2759, %v39_v29  }
   0xd   :  { %v265_v43 = vand.u32 4294901760, %v264_v35  ;;  %v2929_v44 = vand.u32 4294901760, %v106_v31  ;;  %v222_v45 = vand.u32 4294901760, %v2922_v37  ;;  %v183_v46 = vsub.f32 %v2899_v28, %v182_v38  ;;  %v42_v47 = vld [vmem:[%s3219_s2 + $0x20] sm:$0xff]  ;;  %63 = vperm.xlu1 %2760, %v41_v34   ;;  %v43_v55 = vld [vmem:[%s3219_s2 + $0x28] sm:$0xff]  ;;  %v44_v0 = vld [vmem:[%s3219_s2 + $0x30] sm:$0xff] }
   0xe   :  { %v2939_v48 = vsub.f32 %v103_v24, %v2919_v36  ;;  %v193_v49 = vsub.f32 %v2905_v30, %v192_v40  ;;  %v203_v50 = vsub.f32 %v2909_v32, %v202_v41  ;;  %v213_v51 = vsub.f32 %v2912_v33, %v212_v42  ;;  %v45_v3 = vld [vmem:[%s3219_s2 + $0x38] sm:$0xff]  ;;  %v873_v7 = vld [vmem:[%s3221_s4] sm:$0xff]  ;;  %v874_v9 = vld [vmem:[%s3221_s4 + $0x8] sm:$0xff] }
   0xf   :  { %2272 = vmatprep.subr.mxu0 %v265_v43  ;;  %v2951_v52 = vsub.f32 %v106_v31, %v2929_v44  ;;  %v184_v53 = vand.u32 4294901760, %v183_v46  ;;  %v223_v54 = vsub.f32 %v2922_v37, %v222_v45  ;;  %v2959_v56 = vand.u32 4294901760, %v109_v39  ;;  %v875_v13 = vld [vmem:[%s3221_s4 + $0x10] sm:$0xff]  ;;  %v876_v14 = vld [vmem:[%s3221_s4 + $0x18] sm:$0xff]  ;;  %v1581_v15 = vld [vmem:[#allocation2] sm:$0x1] }
  0x10   :  { %2273 = vmatpush3.xpose.msra.mxu0 %v265_v43  ;;  %v232_v57 = vand.u32 4294901760, %v2939_v48  ;;  %v194_v58 = vand.u32 4294901760, %v193_v49  ;;  %v204_v59 = vand.u32 4294901760, %v203_v50  ;;  %68 = vperm.xlu0 %2759, %v42_v47   ;;  %v214_v62 = vand.u32 4294901760, %v213_v51  ;;  %v870_v29 = vld [vmem:[%s3220_s3 + $0x8] sm:$0xff]  ;;  %v872_v35 = vld [vmem:[%s3220_s3 + $0x18] sm:$0xff] }
  0x11   :  { %2286 = vmatprep.subr.mxu0 %v2872_v18  ;;  %v242_v60 = vand.u32 4294901760, %v2951_v52  ;;  %2260 = vmatprep.mubr.f32.mxu1 %v184_v53  ;;  %v251_v61 = vsub.f32 %v109_v39, %v2959_v56  ;;  %v224_v1 = vand.u32 4294901760, %v223_v54  ;;  %vm897_vm1 = vcmask 523264  }
  0x12   :  { %2261 = vmatmul.mubr.f32.vlgmr.msra.gmra.mrb[0].mxu1 %v194_v58  ;;  %v233_v63 = vsub.f32 %v2939_v48, %v232_v57  ;;  %73 = vperm.xlu1 %2760, %v43_v55   ;;  %vm2791_vm2 = vmmov 0   ;;  %vm2085_vm3 = vcmask 57344  }
  0x13   :  { %2275 = vmatmul.mubr.f32.vlgmr.msra.gmra.mrb[0].mxu0 %v2882_v21  ;;  %2263 = vmatprep.mubr.f32.mxu1 %v204_v59  ;;  %v243_v2 = vsub.f32 %v2951_v52, %v242_v60  ;;  %v252_v4 = vand.u32 4294901760, %v251_v61 }
  0x14   :  { %2277 = vmatprep.mubr.f32.mxu0 %v2884_v22  ;;  %2287 = vmatpush3.xpose.msra.mxu0 %v2872_v18  ;;  %v234_v5 = vand.u32 4294901760, %v233_v63 }
  0x15   :  { %2300 = vmatprep.subr.mxu0 %v2857_v10  ;;  %78 = vperm.xlu0 %2759, %v44_v0   ;;  %v253_v6 = vsub.f32 %v251_v61, %v252_v4  ;;  %v244_v8 = vand.u32 4294901760, %v243_v2 }
  0x16   :  { %2264 = vmatmul.mubr.f32.gmra.mrb[2].mxu1 %v214_v62  ;;  %83 = vperm.xlu1 %2760, %v45_v3  }
  0x17   :  { %2278 = vmatmul.mubr.f32.gmra.mrb[2].mxu0 %v2886_v23  ;;  %2266 = vmatprep.mubr.f32.mxu1 %v224_v1  ;;  %v254_v12 = vand.u32 4294901760, %v253_v6 }
  0x18   :  { %2280 = vmatprep.mubr.f32.mxu0 %v2893_v26 }
  0x19   :  { %879 = vperm.xlu0 %2759, %v873_v7  }
  0x1a   :  { %2267 = vmatmul.mubr.f32.gmra.mrb[4].mxu1 %v234_v5  ;;  %884 = vperm.xlu1 %2760, %v874_v9  }
  0x1b   :  { %2281 = vmatmul.mubr.f32.gmra.mrb[4].mxu0 %v2919_v36  ;;  %2269 = vmatprep.mubr.f32.mxu1 %v244_v8 }
  0x1c   :  { %2283 = vmatprep.mubr.f32.mxu0 %v2929_v44 }
  0x1d   :  { %889 = vperm.xlu0 %2759, %v875_v13  }
  0x1e   :  { %2270 = vmatmul.mubr.f32.gmra.mrb[6].mxu1 %v254_v12  ;;  %894 = vperm.xlu1 %2760, %v876_v14  }
  0x1f   :  { %2284 = vmatmul.mubr.f32.gmra.mrb[6].mxu0 %v2959_v56 }
  0x20   :  { %2288 = vmatprep.mubr.f32.mxu0 %v2899_v28 }
  0x21   :  { %1584 = vperm.xlu0 %2759, %v1581_v15  }
  0x23   :  { %2289 = vmatmul.mubr.f32.vlgmr.msra.gmra.mrb[0].mxu0 %v2905_v30  ;;  %v871_v30 = vld [vmem:[%s3220_s3 + $0x10] sm:$0xff] }
  0x24   :  { %2291 = vmatprep.mubr.f32.mxu0 %v2909_v32  ;;  %2301 = vmatpush3.xpose.msra.mxu0 %v2857_v10  ;;  %v902_v32 = vsel %vm897_vm1, %v870_v29, 0  ;;  %v905_v34 = vsel %vm897_vm1, %v871_v30, 0 }
  0x25   :  { %2314 = vmatprep.subr.mxu0 %v2891_v25 }
  0x27   :  { %2292 = vmatmul.mubr.f32.gmra.mrb[2].mxu0 %v2912_v33 }
  0x28   :  { %2294 = vmatprep.mubr.f32.mxu0 %v2922_v37  ;;  %v3062_v37 = vand.u32 4294901760, %v905_v34 }
  0x2b   :  { %2295 = vmatmul.mubr.f32.gmra.mrb[4].mxu0 %v2939_v48 }
  0x2c   :  { %2297 = vmatprep.mubr.f32.mxu0 %v2951_v52 }
  0x2f   :  { %2298 = vmatmul.mubr.f32.gmra.mrb[6].mxu0 %v251_v61 }
  0x30   :  { %2302 = vmatprep.mubr.f32.mxu0 %v182_v38  ;;  %v908_v38 = vsel %vm897_vm1, %v872_v35, 0 }
  0x33   :  { %2303 = vmatmul.mubr.f32.vlgmr.msra.gmra.mrb[0].mxu0 %v192_v40 }
  0x34   :  { %2305 = vmatprep.mubr.f32.mxu0 %v202_v41  ;;  %2315 = vmatpush3.xpose.msra.mxu0 %v2891_v25 }
  0x35   :  { %2328 = vmatprep.subr.mxu0 %v2857_v10 }
  0x37   :  { %2306 = vmatmul.mubr.f32.gmra.mrb[2].mxu0 %v212_v42  ;;  %v3068_v42 = vand.u32 4294901760, %v908_v38 }
  0x38   :  { %2308 = vmatprep.mubr.f32.mxu0 %v222_v45 }
  0x39   :  { %v3075_v52 = vsub.f32 %v908_v38, %v3068_v42 }
  0x3b   :  { %2309 = vmatmul.mubr.f32.gmra.mrb[4].mxu0 %v232_v57  ;;  %v1015_v2 = vand.u32 4294901760, %v3075_v52 }
  0x3c   :  { %2311 = vmatprep.mubr.f32.mxu0 %v242_v60 }
  0x3f   :  { %2312 = vmatmul.mubr.f32.gmra.mrb[6].mxu0 %v252_v4 }
  0x40   :  { %2316 = vmatprep.mubr.f32.mxu0 %v2859_v11 }
  0x43   :  { %2317 = vmatmul.mubr.f32.vlgmr.msra.gmra.mrb[0].mxu0 %v2882_v21 }
  0x44   :  { %2319 = vmatprep.mubr.f32.mxu0 %v2884_v22  ;;  %2329 = vmatpush3.xpose.msra.mxu0 %v2857_v10  ;;  %v869_v10 = vld [vmem:[%s3220_s3] sm:$0xff] }
  0x47   :  { %2320 = vmatmul.mubr.f32.gmra.mrb[2].mxu0 %v2886_v23 }
  0x48   :  { %2322 = vmatprep.mubr.f32.mxu0 %v2893_v26 }
  0x4b   :  { %2323 = vmatmul.mubr.f32.gmra.mrb[4].mxu0 %v2919_v36 }
  0x4c   :  { %2325 = vmatprep.mubr.f32.mxu0 %v2929_v44 }
  0x4f   :  { %2326 = vmatmul.mubr.f32.gmra.mrb[6].mxu0 %v2959_v56 }
  0x50   :  { %2330 = vmatprep.mubr.f32.mxu0 %v2859_v11  ;;  %v899_v11 = vsel %vm897_vm1, %v869_v10, 0 }
  0x51   :  { %v3040_v16 = vand.u32 4294901760, %v899_v11 }
  0x53   :  { %2331 = vmatmul.mubr.f32.vlgmr.msra.gmra.mrb[0].mxu0 %v2882_v21  ;;  %v3043_v17 = vsub.f32 %v899_v11, %v3040_v16 }
  0x54   :  { %2333 = vmatprep.mubr.f32.mxu0 %v2884_v22 }
  0x55   :  { %v985_v18 = vand.u32 4294901760, %v3043_v17 }
  0x57   :  { %2334 = vmatmul.mubr.f32.gmra.mrb[2].mxu0 %v2886_v23  ;;  %v986_v19 = vsub.f32 %v3043_v17, %v985_v18 }
  0x58   :  { %2336 = vmatprep.mubr.f32.mxu0 %v2893_v26 }
  0x59   :  { %v987_v20 = vand.u32 4294901760, %v986_v19 }
  0x5b   :  { %2337 = vmatmul.mubr.f32.gmra.mrb[4].mxu0 %v2919_v36  ;;  %2358 = vmatprep.mubr.f32.mxu1 %v987_v20  ;;  %v3060_v36 = vand.u32 4294901760, %v902_v32 }
  0x5c   :  { %2339 = vmatprep.mubr.f32.mxu0 %v2929_v44  ;;  %v3071_v44 = vsub.f32 %v905_v34, %v3062_v37 }
  0x5d   :  { %v3066_v41 = vsub.f32 %v902_v32, %v3060_v36 }
  0x5e   :  { %v1005_v55 = vand.u32 4294901760, %v3071_v44 }
  0x5f   :  { %2340 = vmatmul.mubr.f32.gmra.mrb[6].mxu0 %v2959_v56  ;;  %v995_v51 = vand.u32 4294901760, %v3066_v41 }
  0x60   :  { %v3087_v6 = vsub.f32 %v3071_v44, %v1005_v55 }
  0x61   :  { %v3081_v1 = vsub.f32 %v3066_v41, %v995_v51 }
  0x86   :  { %v49_v33 = vpop.permute.xlu0 %48 }
  0x88   :  { %v59_v31 = vpop.permute.xlu1 %58 }
  0x8b   :  { %v54_v40 = vpop.permute.xlu0 %53 }
  0x8c   :  { %v64_v39 = vpop.permute.xlu1 %63 }
  0x8f   :  { %v69_v56 = vpop.permute.xlu0 %68 }
  0x91   :  { %v74_v49 = vpop.permute.xlu1 %73 }
  0x95   :  { %v84_v7 = vpop.permute.xlu1 %83 }
  0xe5   :  { %v2262_v21 = vpop.f32.mrb[0].mxu1 }
  0xe6   :  { %v186_v22 = vpop.f32.mrb[1].mxu1  ;;  %v197_v43 = vadd.f32 %v2262_v21, %v54_v40  ;;  %v79_v21 = vpop.permute.xlu0 %78 }
  0xe7   :  { %v187_v45 = vadd.f32 %v186_v22, %v49_v33 }
  0xe9   :  { %v2265_v23 = vpop.f32.mrb[2].mxu1 }
  0xea   :  { %v206_v24 = vpop.f32.mrb[3].mxu1  ;;  %v217_v53 = vadd.f32 %v2265_v23, %v64_v39 }
  0xeb   :  { %v207_v57 = vadd.f32 %v206_v24, %v59_v31 }
  0xed   :  { %v2268_v25 = vpop.f32.mrb[4].mxu1 }
  0xee   :  { %v226_v26 = vpop.f32.mrb[5].mxu1  ;;  %v237_v3 = vadd.f32 %v2268_v25, %v74_v49 }
  0xef   :  { %v227_v8 = vadd.f32 %v226_v26, %v69_v56 }
  0xf1   :  { %v2271_v27 = vpop.f32.mrb[6].mxu1 }
  0xf2   :  { %v246_v28 = vpop.f32.mrb[7].mxu1  ;;  %v257_v15 = vadd.f32 %v2271_v27, %v84_v7 }
  0xf3   :  { %v247_v29 = vadd.f32 %v246_v28, %v79_v21  ;;  %v997_v21 = vand.u32 4294901760, %v3081_v1 }
 0x126   :  { %v2332_v46 = vpop.f32.mrb[0].mxu0 }
 0x127   :  { %v2673_v47 = vadd.f32 %v2332_v46, %v197_v43  ;;  %v815_v48 = vpop.f32.mrb[1].mxu0 }
 0x128   :  { %v2675_v50 = vadd.f32 %v815_v48, %v187_v45 }
 0x129   :  { %v862_v54 = vmax.f32 %v2673_v47, 0.0 }
 0x12a   :  { %v861_v58 = vmax.f32 %v2675_v50, 0.0  ;;  %v2335_v59 = vpop.f32.mrb[2].mxu0 }
 0x12b   :  { %v914_v60 = vand.u32 4294901760, %v862_v54  ;;  %v2677_v61 = vadd.f32 %v2335_v59, %v217_v53  ;;  %v827_v62 = vpop.f32.mrb[3].mxu0 }
 0x12c   :  { %v911_v63 = vand.u32 4294901760, %v861_v58  ;;  %v2679_v0 = vadd.f32 %v827_v62, %v207_v57 }
 0x12d   :  { %v1032_v4 = vsub.f32 %v862_v54, %v914_v60  ;;  %v864_v5 = vmax.f32 %v2677_v61, 0.0 }
 0x12e   :  { %v3089_v9 = vpack.c.bf16 %v914_v60, %v911_v63  ;;  %v1025_v12 = vsub.f32 %v861_v58, %v911_v63  ;;  %v863_v13 = vmax.f32 %v2679_v0, 0.0  ;;  %v2338_v14 = vpop.f32.mrb[4].mxu0 }
 0x12f   :  { %v1033_v10 = vand.u32 4294901760, %v1032_v4  ;;  %v920_v11 = vand.u32 4294901760, %v864_v5  ;;  %v2681_v19 = vadd.f32 %v2338_v14, %v237_v3  ;;  %v839_v20 = vpop.f32.mrb[5].mxu0 }
 0x130   :  { %v1026_v22 = vand.u32 4294901760, %v1025_v12  ;;  %v917_v23 = vand.u32 4294901760, %v863_v13  ;;  %v2683_v24 = vadd.f32 %v839_v20, %v227_v8  ;;  %2541 = vmatprep.subr.bf16.mxu1 %v3089_v9  ;;  %v3092_v25 = vpack.c.bf16 %v1032_v4, %v1025_v12 }
 0x131   :  { %v1046_v26 = vsub.f32 %v864_v5, %v920_v11  ;;  %v866_v30 = vmax.f32 %v2681_v19, 0.0  ;;  %2543 = vmatpush3.bf16.msra.mxu1 %v3089_v9  ;;  %v1034_v31 = vsub.f32 %v1032_v4, %v1033_v10 }
 0x132   :  { %v3095_v32 = vpack.c.bf16 %v920_v11, %v917_v23  ;;  %v1039_v27 = vsub.f32 %v863_v13, %v917_v23  ;;  %v865_v33 = vmax.f32 %v2683_v24, 0.0  ;;  %v2341_v34 = vpop.f32.mrb[6].mxu0  ;;  %v1027_v35 = vsub.f32 %v1025_v12, %v1026_v22 }
 0x133   :  { %v1047_v38 = vand.u32 4294901760, %v1046_v26  ;;  %v926_v39 = vand.u32 4294901760, %v866_v30  ;;  %v2685_v40 = vadd.f32 %v2341_v34, %v257_v15  ;;  %v851_v43 = vpop.f32.mrb[7].mxu0  ;;  %v1035_v45 = vand.u32 4294901760, %v1034_v31 }
 0x134   :  { %v1040_v46 = vand.u32 4294901760, %v1039_v27  ;;  %v923_v47 = vand.u32 4294901760, %v865_v33  ;;  %v2687_v48 = vadd.f32 %v851_v43, %v247_v29  ;;  %2545 = vmatprep.subr.bf16.mxu1 %v3095_v32  ;;  %v1028_v28 = vand.u32 4294901760, %v1027_v35 }
 0x135   :  { %v1060_v49 = vsub.f32 %v866_v30, %v926_v39  ;;  %v868_v50 = vmax.f32 %v2685_v40, 0.0  ;;  %2547 = vmatpush3.bf16.msra.mxu1 %v3095_v32  ;;  %v1048_v53 = vsub.f32 %v1046_v26, %v1047_v38  ;;  %v2576_v54 = vpack.c.bf16 %v1046_v26, %v1039_v27 }
 0x136   :  { %v3099_v56 = vpack.c.bf16 %v926_v39, %v923_v47  ;;  %v1053_v57 = vsub.f32 %v865_v33, %v923_v47  ;;  %v867_v58 = vmax.f32 %v2687_v48, 0.0  ;;  %v2556_v59 = vpack.c.bf16 %v1035_v45, %v1028_v28 }
 0x137   :  { %v1061_v60 = vand.u32 4294901760, %v1060_v49  ;;  %v932_v61 = vand.u32 4294901760, %v868_v50  ;;  %v1041_v62 = vsub.f32 %v1039_v27, %v1040_v46  ;;  %v1049_v63 = vand.u32 4294901760, %v1048_v53 }
 0x138   :  { %v1054_v0 = vand.u32 4294901760, %v1053_v57  ;;  %v929_v3 = vand.u32 4294901760, %v867_v58  ;;  %2549 = vmatprep.subr.bf16.mxu1 %v3099_v56  ;;  %v2580_v4 = vpack.c.bf16 %v1060_v49, %v1053_v57  ;;  %v3102_v5 = vpack.c.bf16 %v1033_v10, %v1026_v22 }
 0x139   :  { %v1074_v7 = vsub.f32 %v868_v50, %v932_v61  ;;  %2551 = vmatpush3.bf16.msra.mxu1 %v3099_v56  ;;  %v1042_v8 = vand.u32 4294901760, %v1041_v62  ;;  %v1062_v12 = vsub.f32 %v1060_v49, %v1061_v60  ;;  %v3105_v13 = vpack.c.bf16 %v1047_v38, %v1040_v46 }
 0x13a   :  { %v3107_v14 = vpack.c.bf16 %v932_v61, %v929_v3  ;;  %v1067_v15 = vsub.f32 %v867_v58, %v929_v3  ;;  %v1055_v11 = vsub.f32 %v1053_v57, %v1054_v0  ;;  %v3109_v19 = vpack.c.bf16 %v1061_v60, %v1054_v0 }
 0x13b   :  { %v1075_v20 = vand.u32 4294901760, %v1074_v7  ;;  %v2560_v23 = vpack.c.bf16 %v1049_v63, %v1042_v8  ;;  %v1063_v24 = vand.u32 4294901760, %v1062_v12  ;;  %v1016_v29 = vsub.f32 %v3075_v52, %v1015_v2 }
 0x13c   :  { %v1068_v10 = vand.u32 4294901760, %v1067_v15  ;;  %2553 = vmatprep.subr.bf16.mxu1 %v3107_v14  ;;  %v1056_v22 = vand.u32 4294901760, %v1055_v11  ;;  %v2584_v26 = vpack.c.bf16 %v1074_v7, %v1067_v15  ;;  %v1007_v31 = vand.u32 4294901760, %v3087_v6 }
 0x13d   :  { %2555 = vmatpush3.bf16.msra.mxu1 %v3107_v14  ;;  %v1076_v30 = vsub.f32 %v1074_v7, %v1075_v20  ;;  %v1017_v38 = vand.u32 4294901760, %v1016_v29 }
 0x13e   :  { %2557 = vmatprep.subr.bf16.mxu1 %v2556_v59  ;;  %v2564_v27 = vpack.c.bf16 %v1063_v24, %v1056_v22  ;;  %v1069_v33 = vsub.f32 %v1067_v15, %v1068_v10  ;;  %v2616_v1 = vpack.c.bf16 %v1075_v20, %v1068_v10 }
 0x13f   :  { %v1077_v34 = vand.u32 4294901760, %v1076_v30  ;;  %v1587_v30 = vlaneseq }
 0x140   :  { %2359 = vmatmul.mubr.f32.vlgmr.msra.gmra.mrb[8].mxu1 %v997_v21  ;;  %v1070_v35 = vand.u32 4294901760, %v1069_v33 }
 0x141   :  { %2559 = vmatpush3.bf16.msra.mxu1 %v2556_v59  ;;  %2361 = vmatprep.mubr.f32.mxu1 %v1007_v31  ;;  %v1588_v31 = vshrl.u32 %v1587_v30, 7 }
 0x142   :  { %2561 = vmatprep.subr.bf16.mxu1 %v2560_v23  ;;  %v2568_v39 = vpack.c.bf16 %v1077_v34, %v1070_v35 }
 0x144   :  { %2362 = vmatmul.mubr.f32.gmra.mrb[10].mxu1 %v1017_v38 }
 0x145   :  { %2563 = vmatpush3.bf16.msra.mxu1 %v2560_v23  ;;  %2380 = vmatprep.mubr.f32.mxu1 %v3040_v16 }
 0x146   :  { %2565 = vmatprep.subr.bf16.mxu1 %v2564_v27 }
 0x149   :  { %2567 = vmatpush3.bf16.msra.mxu1 %v2564_v27  ;;  %v1589_v27 = vsub.s32 0, %v1588_v31 }
 0x14a   :  { %2569 = vmatprep.subr.bf16.mxu1 %v2568_v39 }
 0x14d   :  { %2571 = vmatpush3.bf16.msra.mxu1 %v2568_v39 }
 0x14e   :  { %2573 = vmatprep.subr.bf16.mxu1 %v3092_v25 }
 0x150   :  { %2381 = vmatmul.mubr.f32.vlgmr.msra.gmra.mrb[8].mxu1 %v3060_v36 }
 0x151   :  { %2575 = vmatpush3.bf16.msra.mxu1 %v3092_v25  ;;  %2383 = vmatprep.mubr.f32.mxu1 %v3062_v37 }
 0x152   :  { %2577 = vmatprep.subr.bf16.mxu1 %v2576_v54 }
 0x154   :  { %2384 = vmatmul.mubr.f32.gmra.mrb[10].mxu1 %v3068_v42 }
 0x155   :  { %2579 = vmatpush3.bf16.msra.mxu1 %v2576_v54  ;;  %2402 = vmatprep.mubr.f32.mxu1 %v3043_v17  ;;  %v2790_v17 = vmov 0.0|0.0  }
 0x156   :  { %2581 = vmatprep.subr.bf16.mxu1 %v2580_v4  ;;  %2642 = vmatprep.subr.bf16.mxu0 %v2790_v17 }
 0x159   :  { %2583 = vmatpush3.bf16.msra.mxu1 %v2580_v4 }
 0x15a   :  { %2585 = vmatprep.subr.bf16.mxu1 %v2584_v26 }
 0x15d   :  { %2587 = vmatpush3.bf16.msra.mxu1 %v2584_v26 }
 0x15e   :  { %2589 = vmatprep.subr.bf16.mxu1 %v3089_v9 }
 0x160   :  { %2403 = vmatmul.mubr.f32.vlgmr.msra.gmra.mrb[8].mxu1 %v3066_v41  ;;  %v885_v41 = vpop.permute.xlu1 %884 }
 0x161   :  { %2591 = vmatpush3.bf16.msra.mxu1 %v3089_v9  ;;  %2405 = vmatprep.mubr.f32.mxu1 %v3071_v44 }
 0x162   :  { %2593 = vmatprep.subr.bf16.mxu1 %v3095_v32 }
 0x164   :  { %2406 = vmatmul.mubr.f32.gmra.mrb[10].mxu1 %v3075_v52 }
 0x165   :  { %2595 = vmatpush3.bf16.msra.mxu1 %v3095_v32  ;;  %2424 = vmatprep.mubr.f32.mxu1 %v985_v18  ;;  %v1580_v18 = vld [vmem:[%s3222_s5] sm:$0x1]  ;;  %s2793_s5 = smov [#allocation3]  }
 0x166   :  { %2597 = vmatprep.subr.bf16.mxu1 %v3099_v56  ;;  %s2093_s24 = sshll.u32 %s2793_s5, 4  ;;  %s2094_s24 = int_to_ptr.vmem [resolvable:$true] %s2093_s24 }
 0x167   :  { %s2765_s1 = scalar_lea.vmem %s2094_s24, 16  ;;  %s2769_s25 = scalar_lea.vmem %s2094_s24, 32 }
 0x168   :  { %p2766_p0 = scmp.ne.s32.totalorder %s2094_s24, %s2765_s1  ;;  %p2770_p1 = scmp.lt.s32.totalorder %s2094_s24, %s2094_s24 }
 0x169   :  { %2599 = vmatpush3.bf16.msra.mxu1 %v3099_v56  ;;  %p2771_p2 = scmp.lt.s32.totalorder %s2769_s25, %s2765_s1 }
 0x16a   :  { %2601 = vmatprep.subr.bf16.mxu1 %v3107_v14 }
 0x16b   :  { %p2772_p3 = por %p2771_p2, %p2770_p1 }
 0x16d   :  { %2603 = vmatpush3.bf16.msra.mxu1 %v3107_v14  ;;  %p2773_p4 = pnand %p2772_p3, %p2766_p0 }
 0x16e   :  { %2605 = vmatprep.subr.bf16.mxu1 %v3102_v5 }
 0x170   :  { %2425 = vmatmul.mubr.f32.vlgmr.msra.gmra.mrb[8].mxu1 %v995_v51 }
 0x171   :  { %2607 = vmatpush3.bf16.msra.mxu1 %v3102_v5  ;;  %2427 = vmatprep.mubr.f32.mxu1 %v1005_v55 }
 0x172   :  { %2609 = vmatprep.subr.bf16.mxu1 %v3105_v13 }
 0x174   :  { %2428 = vmatmul.mubr.f32.gmra.mrb[10].mxu1 %v1015_v2 }
 0x175   :  { %2611 = vmatpush3.bf16.msra.mxu1 %v3105_v13  ;;  %2446 = vmatprep.mubr.f32.mxu1 %v3040_v16 }
 0x176   :  { %2613 = vmatprep.subr.bf16.mxu1 %v3109_v19 }
 0x179   :  { %2615 = vmatpush3.bf16.msra.mxu1 %v3109_v19 }
 0x17a   :  { %2617 = vmatprep.subr.bf16.mxu1 %v2616_v1 }
 0x17d   :  { %2619 = vmatpush3.bf16.msra.mxu1 %v2616_v1 }
 0x17e   :  { %2621 = vmatprep.subr.bf16.mxu1 %v3089_v9 }
 0x180   :  { %2447 = vmatmul.mubr.f32.vlgmr.msra.gmra.mrb[8].mxu1 %v3060_v36 }
 0x181   :  { %2623 = vmatpush3.bf16.msra.mxu1 %v3089_v9  ;;  %2449 = vmatprep.mubr.f32.mxu1 %v3062_v37  ;;  %v895_v9 = vpop.permute.xlu1 %894 }
 0x182   :  { %2625 = vmatprep.subr.bf16.mxu1 %v3095_v32 }
 0x184   :  { %2450 = vmatmul.mubr.f32.gmra.mrb[10].mxu1 %v3068_v42 }
 0x185   :  { %2627 = vmatpush3.bf16.msra.mxu1 %v3095_v32  ;;  %2468 = vmatprep.mubr.f32.mxu1 %v3040_v16  ;;  %v2792_v16 = vmov 0.0  }
 0x186   :  { %2629 = vmatprep.subr.bf16.mxu1 %v3099_v56  ;;  %2493 = vmatprep.mubr.msk.f32.mxu0 %vm2791_vm2, %v2792_v16 }
 0x189   :  { %2631 = vmatpush3.bf16.msra.mxu1 %v3099_v56 }
 0x18a   :  { %2633 = vmatprep.subr.bf16.mxu1 %v3107_v14 }
 0x18d   :  { %2635 = vmatpush3.bf16.msra.mxu1 %v3107_v14 }
 0x18e   :  { %2636 = vmatprep.subr.bf16.mxu1 %v2790_v17 }
 0x190   :  { %2469 = vmatmul.mubr.f32.vlgmr.msra.gmra.mrb[8].mxu1 %v3060_v36  ;;  %v1592_v36 = vsel %vm86_vm0, %v1580_v18, 0 }
 0x191   :  { %2471 = vmatprep.mubr.f32.mxu1 %v3062_v37  ;;  %v3176_v37 = vand.u32 4294901760, %v1592_v36 }
 0x193   :  { %v3179_v55 = vsub.f32 %v1592_v36, %v3176_v37 }
 0x194   :  { %2472 = vmatmul.mubr.f32.gmra.mrb[10].mxu1 %v3068_v42  ;;  %v880_v42 = vpop.permute.xlu0 %879 }
 0x195   :  { %2482 = vmatprep.mubr.msk.f32.mxu1 %vm2791_vm2, %v2792_v16  ;;  %v1665_v47 = vand.u32 4294901760, %v3179_v55 }
 0x197   :  { %v1666_v59 = vsub.f32 %v3179_v55, %v1665_v47 }
 0x198   :  { %v890_v40 = vpop.permute.xlu0 %889 }
 0x199   :  { %v1667_v13 = vand.u32 4294901760, %v1666_v59 }
 0x19c   :  { %v1585_v33 = vpop.permute.xlu0 %1584 }
 0x19d   :  { %v1590_v1 = vrot.slane %v1585_v33, %v1589_v27 }
 0x263   :  { %v2470_v44 = vpop.f32.mrb[8].mxu1 }
 0x264   :  { %v2688_v51 = vadd.f32 %v2470_v44, %v885_v41  ;;  %v1554_v52 = vpop.f32.mrb[9].mxu1 }
 0x265   :  { %v2689_v2 = vadd.f32 %v1554_v52, %v880_v42 }
 0x266   :  { %v1577_v6 = vmax.f32 %v2688_v51, 0.0 }
 0x267   :  { %v1576_v25 = vmax.f32 %v2689_v2, 0.0  ;;  %v2473_v32 = vpop.f32.mrb[10].mxu1 }
 0x268   :  { %v1598_v43 = vand.u32 4294901760, %v1577_v6  ;;  %v2690_v45 = vadd.f32 %v2473_v32, %v895_v9  ;;  %v1566_v46 = vpop.f32.mrb[11].mxu1 }
 0x269   :  { %v1595_v48 = vand.u32 4294901760, %v1576_v25  ;;  %v2691_v28 = vadd.f32 %v1566_v46, %v890_v40 }
 0x26a   :  { %v1682_v49 = vsub.f32 %v1577_v6, %v1598_v43  ;;  %v1579_v50 = vmax.f32 %v2690_v45, 0.0 }
 0x26b   :  { %v2637_v53 = vpack.c.bf16 %v1598_v43, %v1595_v48  ;;  %v1675_v54 = vsub.f32 %v1576_v25, %v1595_v48  ;;  %v1578_v56 = vmax.f32 %v2691_v28, 0.0 }
 0x26c   :  { %v1683_v57 = vand.u32 4294901760, %v1682_v49  ;;  %v1604_v58 = vand.u32 4294901760, %v1579_v50 }
 0x26d   :  { %v1676_v60 = vand.u32 4294901760, %v1675_v54  ;;  %v1601_v61 = vand.u32 4294901760, %v1578_v56  ;;  %2638 = vmatpush3.bf16.msra.mxu1 %v2637_v53  ;;  %v2649_v62 = vpack.c.bf16 %v1682_v49, %v1675_v54 }
 0x26e   :  { %v1684_v63 = vsub.f32 %v1682_v49, %v1683_v57  ;;  %v1696_v0 = vsub.f32 %v1579_v50, %v1604_v58  ;;  %2639 = vmatprep.subr.bf16.mxu1 %v2790_v17 }
 0x26f   :  { %v1677_v3 = vsub.f32 %v1675_v54, %v1676_v60  ;;  %v2640_v4 = vpack.c.bf16 %v1604_v58, %v1601_v61  ;;  %v1689_v5 = vsub.f32 %v1578_v56, %v1601_v61  ;;  %v2661_v7 = vpack.c.bf16 %v1683_v57, %v1676_v60 }
 0x270   :  { %v1685_v8 = vand.u32 4294901760, %v1684_v63  ;;  %v1697_v12 = vand.u32 4294901760, %v1696_v0 }
 0x271   :  { %v1678_v14 = vand.u32 4294901760, %v1677_v3  ;;  %v1690_v15 = vand.u32 4294901760, %v1689_v5  ;;  %2641 = vmatpush3.bf16.msra.mxu1 %v2640_v4  ;;  %v2652_v11 = vpack.c.bf16 %v1696_v0, %v1689_v5 }
 0x272   :  { %v1698_v19 = vsub.f32 %v1696_v0, %v1697_v12 }
 0x273   :  { %v1691_v20 = vsub.f32 %v1689_v5, %v1690_v15  ;;  %v2643_v21 = vpack.c.bf16 %v1685_v8, %v1678_v14  ;;  %v2664_v23 = vpack.c.bf16 %v1697_v12, %v1690_v15 }
 0x274   :  { %v1699_v24 = vand.u32 4294901760, %v1698_v19  ;;  %2483 = vmatmul.mubr.f32.vlgmr.msra.gmra.mrb[12].mxu1 %v1667_v13 }
 0x275   :  { %v1692_v10 = vand.u32 4294901760, %v1691_v20  ;;  %2644 = vmatpush3.bf16.msra.mxu0 %v2643_v21 }
 0x276   :  { %2645 = vmatprep.subr.bf16.mxu0 %v2790_v17 }
 0x277   :  { %v2646_v22 = vpack.c.bf16 %v1699_v24, %v1692_v10 }
 0x279   :  { %2647 = vmatpush3.bf16.msra.mxu0 %v2646_v22 }
 0x27a   :  { %2648 = vmatprep.subr.bf16.mxu0 %v2790_v17 }
 0x27c   :  { %2494 = vmatmul.mubr.f32.vlgmr.msra.gmra.mrb[8].mxu0 %v3176_v37 }
 0x27d   :  { %2650 = vmatpush3.bf16.msra.mxu0 %v2649_v62  ;;  %2504 = vmatprep.mubr.msk.f32.mxu0 %vm2791_vm2, %v2792_v16 }
 0x27e   :  { %2651 = vmatprep.subr.bf16.mxu0 %v2790_v17 }
 0x281   :  { %2653 = vmatpush3.bf16.msra.mxu0 %v2652_v11 }
 0x282   :  { %2654 = vmatprep.subr.bf16.mxu0 %v2790_v17 }
 0x284   :  { %2505 = vmatmul.mubr.f32.vlgmr.msra.gmra.mrb[8].mxu0 %v3179_v55 }
 0x285   :  { %2656 = vmatpush3.bf16.msra.mxu0 %v2637_v53  ;;  %2515 = vmatprep.mubr.msk.f32.mxu0 %vm2791_vm2, %v2792_v16 }
 0x286   :  { %2657 = vmatprep.subr.bf16.mxu0 %v2790_v17 }
 0x289   :  { %2659 = vmatpush3.bf16.msra.mxu0 %v2640_v4 }
 0x28a   :  { %2660 = vmatprep.subr.bf16.mxu0 %v2790_v17 }
 0x28c   :  { %2516 = vmatmul.mubr.f32.vlgmr.msra.gmra.mrb[8].mxu0 %v1665_v47 }
 0x28d   :  { %2662 = vmatpush3.bf16.msra.mxu0 %v2661_v7  ;;  %2526 = vmatprep.mubr.msk.f32.mxu0 %vm2791_vm2, %v2792_v16 }
 0x28e   :  { %2663 = vmatprep.subr.bf16.mxu0 %v2790_v17 }
 0x291   :  { %2665 = vmatpush3.bf16.msra.mxu0 %v2664_v23 }
 0x292   :  { %2666 = vmatprep.subr.bf16.mxu0 %v2790_v17 }
 0x294   :  { %2527 = vmatmul.mubr.f32.vlgmr.msra.gmra.mrb[8].mxu0 %v3176_v37 }
 0x295   :  { %2668 = vmatpush3.bf16.msra.mxu0 %v2637_v53  ;;  %2537 = vmatprep.mubr.msk.f32.mxu0 %vm2791_vm2, %v2792_v16 }
 0x296   :  { %2669 = vmatprep.subr.bf16.mxu0 %v2790_v17 }
 0x299   :  { %2671 = vmatpush3.bf16.msra.mxu0 %v2640_v4 }
 0x29c   :  { %2538 = vmatmul.mubr.f32.vlgmr.msra.gmra.mrb[8].mxu0 %v3176_v37 }
 0x347   :  { %v1669_v29 = vpop.f32.mrb[12].mxu1 }
 0x348   :  { %v2484_v26 = vpop.f32.mrb[13].mxu1  ;;  %v1670_v34 = vadd.f32 %v1669_v29, %v1590_v1 }
 0x36f   :  { %v2075_v35 = vpop.f32.mrb[8].mxu0 }
 0x370   :  { %v2693_v38 = vadd.f32 %v2075_v35, %v1670_v34  ;;  %v2539_v39 = vpop.f32.mrb[9].mxu0 }
 0x372   :  { %v2101_v18 = vmul.f32 -1.442695, %v2693_v38 }
 0x374   :  { %2761 = vpow2.f32 %v2101_v18 }
 0x37e   :  { %v2762_v36 = vpop.eup %2761 }
 0x37f   :  { %v2082_v16 = vadd.f32 1.0, %v2762_v36 }
 0x381   :  { %2763 = vrcp.f32 %v2082_v16 }
 0x38b   :  { %v2764_v17 = vpop.eup %2763 }
 0x38c   :  { %2086 = vst.msk [vmem:[#allocation3] sm:$0x1] %vm2085_vm3, %v2764_v17 }
 0x38d   :  { %2776 = shalt.err (!%p2773_p4)
}
 0x38e   :  { %s2777_s28 = scalar_lea.hbm %s3224_s7, 16 }
 0x38f   :  { %p2778_p5 = scmp.ne.s32.totalorder %s3224_s7, %s2777_s28  ;;  %p2781_p6 = scmp.lt.u32.totalorder %s2777_s28, %s3224_s7 }
 0x391   :  { %p2783_p7 = pnand %p2781_p6, %p2778_p5 }
 0x393   :  { %2786 = shalt.err (!%p2783_p7)
}
 0x394   :  { %2096 = dma.vmem_to_hbm [thread:$0]  %s2094_s24, 16, %s3224_s7, [#allocation4]  }
 0x395   :  { %2787 = dma.done.wait [#allocation4], 16  }
 0x396   :  { %2788 = vsyncadd [#allocation4], 4294967280 }
 0x397   :  { %2100 = vsyncpa [#allocation4], 1 }

</bundles_post_ra>
